<compile_context>
chip_gen: v7x
topology: tpu7x:2x2x1
jax: 0.10.0
libtpu: 0.0.40
codegen_flags: <defaults>
</compile_context>

<pallas_src>
import jax
import jax.numpy as jnp
import numpy as np
from jax.experimental import pallas as pl
from jax.experimental.pallas import tpu as pltpu

# FlappyBird-v0 with use_lidar=True: obs dim 180, +2 extra features -> 182.
INPUT_SIZE = 182
HIDDEN1 = 128
HIDDEN2 = 64
NUM_ACTIONS = 2

H2_PAD = 128        # hidden2 64 -> 128 (zero pad; exact: ReLU(0)=0 and matching zero rows in w3)
OUT_PAD = 8         # output 2 -> 8 (zero cols; wrapper slices [:, :2]); tiny HBM writeback
MAX_BT = 2048       # max batch rows per grid step (multiple of 8); ~1.5 MB/tile f32, fits VMEM easily


def _qnet_kernel(x_ref, w1_ref, b1_ref, w2_ref, b2_ref, w3_ref, b3_ref, o_ref):
    """Fused 3-layer MLP: 3 MXU matmuls + 2 VPU ReLUs, f32 accumulation throughout."""
    # NOTE: f32 jnp.dot on TPU uses the default (reduced) matmul precision. If bit-faithful
    # f32 parity with the PyTorch reference is required, pass precision=lax.Precision.HIGHEST
    # here and in the reference (costs extra MXU passes; not needed for a DQN Q-head).
    h1 = jnp.dot(x_ref[...], w1_ref[...], preferred_element_type=jnp.float32) + b1_ref[...]
    h1 = jnp.maximum(h1, 0.0)                                      # (bt, 128)
    h2 = jnp.dot(h1.astype(w2_ref.dtype), w2_ref[...],
                 preferred_element_type=jnp.float32) + b2_ref[...]
    h2 = jnp.maximum(h2, 0.0)                                      # (bt, 128)
    out = jnp.dot(h2.astype(w3_ref.dtype), w3_ref[...],
                  preferred_element_type=jnp.float32) + b3_ref[...]
    o_ref[...] = out.astype(o_ref.dtype)                           # (bt, OUT_PAD)


def prepare_params(params, *, use_bf16=False):
    """Pad PyTorch-layout params into kernel layout. Done once, outside the hot path."""
    w1, b1, w2, b2, w3, b3 = params
    as_row = lambda b: jnp.asarray(b).reshape(1, -1)   # accept (out,) or (1, out) biases
    b1, b2, b3 = as_row(b1), as_row(b2), as_row(b3)
    # Hidden2 64 -> 128 and output 2 -> 8 padded with zeros (numerically exact).
    w2p = jnp.pad(w2, ((0, 0), (0, H2_PAD - HIDDEN2)))                           # (128, 128)
    b2p = jnp.pad(b2, ((0, 0), (0, H2_PAD - HIDDEN2)))                           # (1, 128)
    w3p = jnp.pad(w3, ((0, H2_PAD - HIDDEN2), (0, OUT_PAD - NUM_ACTIONS)))       # (128, 8)
    b3p = jnp.pad(b3, ((0, 0), (0, OUT_PAD - NUM_ACTIONS)))                      # (1, 8)
    wdt = jnp.bfloat16 if use_bf16 else jnp.float32
    # Optional bf16 weights halve the dominant activation/weight DMA; biases stay f32
    # because they are added to the f32 MXU accumulator. Default is f32 (no numerics change).
    return (w1.astype(wdt), b1.astype(jnp.float32),
            w2p.astype(wdt), b2p.astype(jnp.float32),
            w3p.astype(wdt), b3p.astype(jnp.float32))


def _round_up(n, m):
    return ((n + m - 1) // m) * m


@jax.jit
def qnetwork_forward(x, padded_params):
    """x: (B, INPUT_SIZE) float32 -> (B, NUM_ACTIONS) float32."""
    w1, b1, w2, b2, w3, b3 = padded_params
    B = x.shape[0]
    act_dtype = w1.dtype            # f32 by default; bf16 if prepare_params(use_bf16=True)

    # Batch tile: multiple of 8, <= MAX_BT, and at most ceil(b_pad/2) so large batches give a
    # grid of length >= 2 (keeps both v7x TensorCores busy). Small batches use one tile.
    b_pad = _round_up(B, 8)
    bt = max(8, min(MAX_BT, _round_up(pl.cdiv(b_pad, 2), 8)))
    b_pad = _round_up(b_pad, bt)

    x_in = x.astype(act_dtype)
    if b_pad != B:
        # Only batch-row padding remains; allow_input_fusion lets XLA fuse this pad into the
        # pallas_call operand rather than materializing x_in in HBM.
        x_in = jnp.pad(x_in, ((0, b_pad - B), (0, 0)))

    itemsize = jnp.dtype(act_dtype).itemsize
    flops = 2 * b_pad * (INPUT_SIZE * HIDDEN1 + HIDDEN1 * H2_PAD + H2_PAD * OUT_PAD)
    bytes_accessed = (
        itemsize * (b_pad * INPUT_SIZE
                    + INPUT_SIZE * HIDDEN1 + HIDDEN1 * H2_PAD + H2_PAD * OUT_PAD)
        + 4 * (HIDDEN1 + H2_PAD + OUT_PAD)          # f32 biases
        + 4 * b_pad * OUT_PAD                       # f32 output
    )

    out_pad = pl.pallas_call(
        _qnet_kernel,
        out_shape=jax.ShapeDtypeStruct((b_pad, OUT_PAD), jnp.float32),
        grid=(b_pad // bt,),
        in_specs=[
            pl.BlockSpec((bt, INPUT_SIZE), lambda i: (i, 0)),        # x: tiled over batch only
            pl.BlockSpec((INPUT_SIZE, HIDDEN1), lambda i: (0, 0)),   # weights/biases: full,
            pl.BlockSpec((1, HIDDEN1), lambda i: (0, 0)),            # resident, reused each step
            pl.BlockSpec((HIDDEN1, H2_PAD), lambda i: (0, 0)),
            pl.BlockSpec((1, H2_PAD), lambda i: (0, 0)),
            pl.BlockSpec((H2_PAD, OUT_PAD), lambda i: (0, 0)),
            pl.BlockSpec((1, OUT_PAD), lambda i: (0, 0)),
        ],
        out_specs=pl.BlockSpec((bt, OUT_PAD), lambda i: (i, 0)),
        compiler_params=pltpu.CompilerParams(
            dimension_semantics=("parallel",),                       # shard batch tiles across TCs
            allow_input_fusion=[True, False, False, False, False, False, False],
        ),
        cost_estimate=pl.CostEstimate(
            flops=flops, transcendentals=0, bytes_accessed=bytes_accessed),
    )(x_in, w1, b1, w2, b2, w3, b3)

    # Strip batch padding and the zero-padded output columns.
    return out_pad[:B, :NUM_ACTIONS]


def init_params(key):
    """Deterministic PyTorch-style (kaiming-uniform-ish) init, stored as (in, out)."""
    ks = jax.random.split(key, 6)

    def linear(kw, kb, fan_in, fan_out):
        bound = 1.0 / np.sqrt(fan_in)
        w = jax.random.uniform(kw, (fan_in, fan_out), jnp.float32, -bound, bound)
        b = jax.random.uniform(kb, (1, fan_out), jnp.float32, -bound, bound)
        return w, b

    w1, b1 = linear(ks[0], ks[1], INPUT_SIZE, HIDDEN1)
    w2, b2 = linear(ks[2], ks[3], HIDDEN1, HIDDEN2)
    w3, b3 = linear(ks[4], ks[5], HIDDEN2, NUM_ACTIONS)
    return (w1, b1, w2, b2, w3, b3)


def reference_forward(x, params):
    w1, b1, w2, b2, w3, b3 = params
    h1 = jnp.maximum(x @ w1 + b1, 0.0)
    h2 = jnp.maximum(h1 @ w2 + b2, 0.0)
    return h2 @ w3 + b3


if __name__ == "__main__":
    key = jax.random.PRNGKey(0)
    k_x, k_x2, k_p = jax.random.split(key, 3)

    params = init_params(k_p)
    padded = prepare_params(params)   # default f32 path (no numerics change vs. reference)

    # Tolerance accommodates the TPU default (reduced, bf16-pass) matmul precision possibly
    # differing between the Mosaic kernel and the XLA reference; structural bugs (missing
    # bias/ReLU/wrong padding) are orders of magnitude larger than this.
    TOL = dict(rtol=5e-3, atol=5e-3)

    # Small acting-step batch: bt = 8, grid = 1.
    # TODO(synk): for tiny per-env-step batches like this, launch overhead dominates; a plain
    # XLA path (or batching env steps) is the right production dispatch for B <= 64.
    batch = 8
    x = jax.random.normal(k_x, (batch, INPUT_SIZE), dtype=jnp.float32)
    out = jax.block_until_ready(qnetwork_forward(x, padded))
    ref = reference_forward(x, params)
    np.testing.assert_allclose(np.asarray(out), np.asarray(ref), **TOL)
    assert out.shape == (batch, NUM_ACTIONS)

    # Replay-buffer-sized batch: 300 -> padded 304, bt = 152, grid = 2 (exercises the
    # pipelined, megacore-parallel batch tiling and the batch-row pad + input fusion).
    batch2 = 300
    x2 = jax.random.normal(k_x2, (batch2, INPUT_SIZE), dtype=jnp.float32)
    out2 = jax.block_until_ready(qnetwork_forward(x2, padded))
    ref2 = reference_forward(x2, params)
    np.testing.assert_allclose(np.asarray(out2), np.asarray(ref2), **TOL)
    assert out2.shape == (batch2, NUM_ACTIONS)

    print("KERNEL_OK")
</pallas_src>

<mosaic_0001>
module attributes {stable_mosaic.version = 11 : i64} {
  func.func @_qnet_kernel(%arg0: i32, %arg1: memref<8x182xf32, #tpu.memory_space<vmem>>, %arg2: memref<182x128xf32, #tpu.memory_space<vmem>>, %arg3: memref<1x128xf32, #tpu.memory_space<vmem>>, %arg4: memref<128x128xf32, #tpu.memory_space<vmem>>, %arg5: memref<1x128xf32, #tpu.memory_space<vmem>>, %arg6: memref<128x8xf32, #tpu.memory_space<vmem>>, %arg7: memref<1x8xf32, #tpu.memory_space<vmem>>, %arg8: memref<8x8xf32, #tpu.memory_space<vmem>>) attributes {dimension_semantics = [#tpu.dimension_semantics<parallel>], iteration_bounds = array<i64: 1>, scalar_prefetch = 0 : i64, scratch_operands = 0 : i64, tpu.core_type = #tpu.core_type<tc>, window_params = [{transform_indices = @transform_0, window_bounds = array<i64: 8, 182>}, {pipeline_mode = #tpu.pipeline_mode<synchronous>, transform_indices = @transform_1, window_bounds = array<i64: 182, 128>}, {pipeline_mode = #tpu.pipeline_mode<synchronous>, transform_indices = @transform_2, window_bounds = array<i64: 1, 128>}, {pipeline_mode = #tpu.pipeline_mode<synchronous>, transform_indices = @transform_3, window_bounds = array<i64: 128, 128>}, {pipeline_mode = #tpu.pipeline_mode<synchronous>, transform_indices = @transform_4, window_bounds = array<i64: 1, 128>}, {pipeline_mode = #tpu.pipeline_mode<synchronous>, transform_indices = @transform_5, window_bounds = array<i64: 128, 8>}, {pipeline_mode = #tpu.pipeline_mode<synchronous>, transform_indices = @transform_6, window_bounds = array<i64: 1, 8>}, {transform_indices = @transform_7, window_bounds = array<i64: 8, 8>}]} {
    %c0 = arith.constant 0 : index
    %c0_0 = arith.constant 0 : index
    %0 = vector.load %arg1[%c0, %c0_0] : memref<8x182xf32, #tpu.memory_space<vmem>>, vector<8x182xf32>
    %c0_1 = arith.constant 0 : index
    %c0_2 = arith.constant 0 : index
    %1 = vector.load %arg2[%c0_1, %c0_2] : memref<182x128xf32, #tpu.memory_space<vmem>>, vector<182x128xf32>
    %cst = arith.constant dense<0.000000e+00> : vector<8x128xf32>
    %2 = tpu.matmul %0, %1, %cst {dimension_numbers = #tpu.dot_dimension_numbers<[1], [0], [0], [1], [0, 0, 1, 1], [], []>} : vector<8x182xf32>, vector<182x128xf32>, vector<8x128xf32> -> vector<8x128xf32>
    %c0_3 = arith.constant 0 : index
    %c0_4 = arith.constant 0 : index
    %3 = vector.load %arg3[%c0_3, %c0_4] : memref<1x128xf32, #tpu.memory_space<vmem>>, vector<1x128xf32>
    %4 = vector.broadcast %3 : vector<1x128xf32> to vector<8x128xf32>
    %5 = arith.addf %2, %4 : vector<8x128xf32>
    %cst_5 = arith.constant 0.000000e+00 : f32
    %6 = vector.broadcast %cst_5 : f32 to vector<8x128xf32>
    %7 = arith.maximumf %5, %6 : vector<8x128xf32>
    %c0_6 = arith.constant 0 : index
    %c0_7 = arith.constant 0 : index
    %8 = vector.load %arg4[%c0_6, %c0_7] : memref<128x128xf32, #tpu.memory_space<vmem>>, vector<128x128xf32>
    %cst_8 = arith.constant dense<0.000000e+00> : vector<8x128xf32>
    %9 = tpu.matmul %7, %8, %cst_8 {dimension_numbers = #tpu.dot_dimension_numbers<[1], [0], [0], [1], [0, 0, 1, 1], [], []>} : vector<8x128xf32>, vector<128x128xf32>, vector<8x128xf32> -> vector<8x128xf32>
    %c0_9 = arith.constant 0 : index
    %c0_10 = arith.constant 0 : index
    %10 = vector.load %arg5[%c0_9, %c0_10] : memref<1x128xf32, #tpu.memory_space<vmem>>, vector<1x128xf32>
    %11 = vector.broadcast %10 : vector<1x128xf32> to vector<8x128xf32>
    %12 = arith.addf %9, %11 : vector<8x128xf32>
    %cst_11 = arith.constant 0.000000e+00 : f32
    %13 = vector.broadcast %cst_11 : f32 to vector<8x128xf32>
    %14 = arith.maximumf %12, %13 : vector<8x128xf32>
    %c0_12 = arith.constant 0 : index
    %c0_13 = arith.constant 0 : index
    %15 = vector.load %arg6[%c0_12, %c0_13] : memref<128x8xf32, #tpu.memory_space<vmem>>, vector<128x8xf32>
    %cst_14 = arith.constant dense<0.000000e+00> : vector<8x8xf32>
    %16 = tpu.matmul %14, %15, %cst_14 {dimension_numbers = #tpu.dot_dimension_numbers<[1], [0], [0], [1], [0, 0, 1, 1], [], []>} : vector<8x128xf32>, vector<128x8xf32>, vector<8x8xf32> -> vector<8x8xf32>
    %c0_15 = arith.constant 0 : index
    %c0_16 = arith.constant 0 : index
    %17 = vector.load %arg7[%c0_15, %c0_16] : memref<1x8xf32, #tpu.memory_space<vmem>>, vector<1x8xf32>
    %18 = vector.broadcast %17 : vector<1x8xf32> to vector<8x8xf32>
    %19 = arith.addf %16, %18 : vector<8x8xf32>
    %c0_17 = arith.constant 0 : index
    %c0_18 = arith.constant 0 : index
    %20 = vector.load %arg8[%c0_17, %c0_18] : memref<8x8xf32, #tpu.memory_space<vmem>>, vector<8x8xf32>
    tpu.vector_store %arg8[%c0_17, %c0_18], %19 {strides = array<i32>} : memref<8x8xf32, #tpu.memory_space<vmem>>, vector<8x8xf32>,
    return
  }
  func.func @transform_0(%arg0: i32) -> (i32, i32) {
    %c0_i32 = arith.constant 0 : i32
    %c0_i32_0 = arith.constant 0 : i32
    return %arg0, %c0_i32 : i32, i32
  }
  func.func @transform_1(%arg0: i32) -> (i32, i32) {
    %c0_i32 = arith.constant 0 : i32
    %c0_i32_0 = arith.constant 0 : i32
    %c0_i32_1 = arith.constant 0 : i32
    return %c0_i32, %c0_i32_0 : i32, i32
  }
  func.func @transform_2(%arg0: i32) -> (i32, i32) {
    %c0_i32 = arith.constant 0 : i32
    %c0_i32_0 = arith.constant 0 : i32
    %c0_i32_1 = arith.constant 0 : i32
    return %c0_i32, %c0_i32_0 : i32, i32
  }
  func.func @transform_3(%arg0: i32) -> (i32, i32) {
    %c0_i32 = arith.constant 0 : i32
    %c0_i32_0 = arith.constant 0 : i32
    %c0_i32_1 = arith.constant 0 : i32
    return %c0_i32, %c0_i32_0 : i32, i32
  }
  func.func @transform_4(%arg0: i32) -> (i32, i32) {
    %c0_i32 = arith.constant 0 : i32
    %c0_i32_0 = arith.constant 0 : i32
    %c0_i32_1 = arith.constant 0 : i32
    return %c0_i32, %c0_i32_0 : i32, i32
  }
  func.func @transform_5(%arg0: i32) -> (i32, i32) {
    %c0_i32 = arith.constant 0 : i32
    %c0_i32_0 = arith.constant 0 : i32
    %c0_i32_1 = arith.constant 0 : i32
    return %c0_i32, %c0_i32_0 : i32, i32
  }
  func.func @transform_6(%arg0: i32) -> (i32, i32) {
    %c0_i32 = arith.constant 0 : i32
    %c0_i32_0 = arith.constant 0 : i32
    %c0_i32_1 = arith.constant 0 : i32
    return %c0_i32, %c0_i32_0 : i32, i32
  }
  func.func @transform_7(%arg0: i32) -> (i32, i32) {
    %c0_i32 = arith.constant 0 : i32
    %c0_i32_0 = arith.constant 0 : i32
    return %arg0, %c0_i32 : i32, i32
  }
}

</mosaic_0001>

<bundles_post_ra>
// kernel: qnetwork_forward.1
= control target key start
LH: loop header
LB: loop body
LE: loop exit
PB: predicated region body
PF: predicated region fallthrough
CT: control target
= control target key end

     0   :  { %12 = vsyncpa [#allocation3], 0  ;;  %s565_s24 = smov [#allocation2]   ;;  %s764_s0 = inlined_call_operand.vmem [shape: f32[8,182], index: 0, kind: input, shape index: {}]   ;;  %s765_s1 = inlined_call_operand.hbm [shape: f32[182,128], index: 1, kind: input, shape index: {}]   ;;  %s766_s2 = inlined_call_operand.vmem [shape: f32[1,128], index: 2, kind: input, shape index: {}]   ;;  %s767_s3 = inlined_call_operand.vmem [shape: f32[128,128], index: 3, kind: input, shape index: {}]   ;;  %s768_s4 = inlined_call_operand.vmem [shape: f32[1,128], index: 4, kind: input, shape index: {}]   ;;  %s769_s5 = inlined_call_operand.vmem [shape: f32[128,8], index: 5, kind: input, shape index: {}]   ;;  %s770_s6 = inlined_call_operand.vmem [shape: f32[1,8], index: 6, kind: input, shape index: {}]   ;;  %s771_s7 = inlined_call_operand.vmem [shape: f32[8,8], index: 7, kind: output, shape index: {}]  }
   0x1   :  { %s20_s25 = sshll.u32 %s565_s24, 4  ;;  %s541_s28 = scalar_lea.hbm %s765_s1, 2944  ;;  %s21_s25 = int_to_ptr.vmem [resolvable:$true] %s20_s25 }
   0x2   :  { %p542_p0 = scmp.ne.s32.totalorder %s765_s1, %s541_s28  ;;  %p545_p1 = scmp.lt.u32.totalorder %s541_s28, %s765_s1 }
   0x4   :  { %p547_p2 = pnand %p545_p1, %p542_p0 }
   0x6   :  { %550 = shalt.err (!%p547_p2)
}
   0x7   :  { %s551_s10 = scalar_lea.vmem %s21_s25, 2944  ;;  %p556_p4 = scmp.lt.s32.totalorder %s21_s25, %s21_s25 }
   0x8   :  { %p552_p3 = scmp.ne.s32.totalorder %s21_s25, %s551_s10  ;;  %p557_p5 = scmp.lt.s32.totalorder %s551_s10, %s551_s10 }
   0xa   :  { %p558_p6 = por %p557_p5, %p556_p4 }
   0xc   :  { %p559_p7 = pnand %p558_p6, %p552_p3 }
   0xe   :  { %562 = shalt.err (!%p559_p7)
}
   0xf   :  { %s566_s11 = smov 128   ;;  %s567_s12 = smov 8  }
  0x10   :  { %26 = dma.hbm_to_vmem [thread:$0]  %s765_s1, 2944, %s21_s25, [#allocation3], %s566_s11, %s566_s11, %s567_s12  }
  0x11   :  { %563 = dma.done.wait [#allocation3], 2944  }
  0x12   :  { %564 = vsyncadd [#allocation3], 4294964352  ;;  %v568_v0 = vmov 0.0|0.0   ;;  %v42_v1 = vld [vmem:[#allocation2] sm:$0xff]  ;;  %v43_v2 = vld [vmem:[#allocation2 + $0x8] sm:$0xff]  ;;  %vm72_vm0 = vcmask 441344  }
  0x13   :  { %454 = vmatprep.subr.bf16.mxu0 %v568_v0  ;;  %487 = vmatprep.subr.bf16.mxu1 %v568_v0  ;;  %v44_v3 = vld [vmem:[#allocation2 + $0x10] sm:$0xff]  ;;  %v455_v4 = vpack.c.bf16 %v43_v2, %v42_v1  ;;  %v45_v5 = vld [vmem:[#allocation2 + $0x18] sm:$0xff]  ;;  %v46_v7 = vld [vmem:[#allocation2 + $0x20] sm:$0xff]  ;;  %v569_v56 = vmov 0.0   ;;  %vm76_vm1 = vcmask 1045504   ;;  %vm570_vm2 = vmmov 0  }
  0x14   :  { %v458_v6 = vpack.c.bf16 %v45_v5, %v44_v3  ;;  %v47_v8 = vld [vmem:[#allocation2 + $0x28] sm:$0xff]  ;;  %v48_v10 = vld [vmem:[#allocation2 + $0x30] sm:$0xff]  ;;  %v49_v12 = vld [vmem:[#allocation2 + $0x38] sm:$0xff]  ;;  %416 = vmatprep.mubr.msk.f32.mxu1 %vm570_vm2, %v569_v56  ;;  %vm338_vm3 = vcmask 64512  }
  0x15   :  { %456 = vmatpush1.bf16.msra.mxu0 %v455_v4  ;;  %v461_v9 = vpack.c.bf16 %v47_v8, %v46_v7  ;;  %v41_v11 = vld [vmem:[%s764_s0 + $0x8] sm:$0xff]  ;;  %v151_v13 = vld [vmem:[%s767_s3] sm:$0xff]  ;;  %v153_v16 = vld [vmem:[%s767_s3 + $0x10] sm:$0xff]  ;;  %v464_v18 = vpack.c.bf16 %v49_v12, %v48_v10 }
  0x16   :  { %457 = vmatprep.subr.bf16.mxu0 %v568_v0  ;;  %347 = vmatprep.mubr.msk.f32.mxu0 %vm72_vm0, %v41_v11  ;;  %v152_v14 = vld [vmem:[%s767_s3 + $0x8] sm:$0xff]  ;;  %v154_v17 = vld [vmem:[%s767_s3 + $0x18] sm:$0xff]  ;;  %v50_v19 = vld [vmem:[#allocation2 + $0x40] sm:$0xff] }
  0x17   :  { %v488_v15 = vpack.c.bf16 %v152_v14, %v151_v13  ;;  %v491_v20 = vpack.c.bf16 %v154_v17, %v153_v16  ;;  %v51_v21 = vld [vmem:[#allocation2 + $0x48] sm:$0xff]  ;;  %v155_v22 = vld [vmem:[%s767_s3 + $0x20] sm:$0xff]  ;;  %v52_v25 = vld [vmem:[#allocation2 + $0x50] sm:$0xff] }
  0x18   :  { %v156_v23 = vld [vmem:[%s767_s3 + $0x28] sm:$0xff]  ;;  %v467_v24 = vpack.c.bf16 %v51_v21, %v50_v19  ;;  %v53_v27 = vld [vmem:[#allocation2 + $0x58] sm:$0xff]  ;;  %v157_v28 = vld [vmem:[%s767_s3 + $0x30] sm:$0xff] }
  0x19   :  { %459 = vmatpush1.bf16.msra.mxu0 %v458_v6  ;;  %489 = vmatpush3.bf16.msra.mxu1 %v488_v15  ;;  %v494_v26 = vpack.c.bf16 %v156_v23, %v155_v22  ;;  %v158_v29 = vld [vmem:[%s767_s3 + $0x38] sm:$0xff]  ;;  %v470_v30 = vpack.c.bf16 %v53_v27, %v52_v25  ;;  %v54_v31 = vld [vmem:[#allocation2 + $0x60] sm:$0xff]  ;;  %v55_v33 = vld [vmem:[#allocation2 + $0x68] sm:$0xff] }
  0x1a   :  { %460 = vmatprep.subr.bf16.mxu0 %v568_v0  ;;  %490 = vmatprep.subr.bf16.mxu1 %v568_v0  ;;  %v497_v32 = vpack.c.bf16 %v158_v29, %v157_v28  ;;  %v159_v34 = vld [vmem:[%s767_s3 + $0x40] sm:$0xff]  ;;  %v160_v35 = vld [vmem:[%s767_s3 + $0x48] sm:$0xff]  ;;  %v473_v36 = vpack.c.bf16 %v55_v33, %v54_v31  ;;  %v56_v37 = vld [vmem:[#allocation2 + $0x70] sm:$0xff] }
  0x1b   :  { %v500_v38 = vpack.c.bf16 %v160_v35, %v159_v34  ;;  %v57_v39 = vld [vmem:[#allocation2 + $0x78] sm:$0xff]  ;;  %v161_v40 = vld [vmem:[%s767_s3 + $0x50] sm:$0xff]  ;;  %v58_v43 = vld [vmem:[#allocation2 + $0x80] sm:$0xff] }
  0x1c   :  { %v162_v41 = vld [vmem:[%s767_s3 + $0x58] sm:$0xff]  ;;  %v476_v42 = vpack.c.bf16 %v57_v39, %v56_v37  ;;  %v59_v45 = vld [vmem:[#allocation2 + $0x88] sm:$0xff]  ;;  %v163_v46 = vld [vmem:[%s767_s3 + $0x60] sm:$0xff] }
  0x1d   :  { %462 = vmatpush1.bf16.msra.mxu0 %v461_v9  ;;  %492 = vmatpush3.bf16.msra.mxu1 %v491_v20  ;;  %v503_v44 = vpack.c.bf16 %v162_v41, %v161_v40  ;;  %v164_v47 = vld [vmem:[%s767_s3 + $0x68] sm:$0xff]  ;;  %v479_v48 = vpack.c.bf16 %v59_v45, %v58_v43  ;;  %v60_v50 = vld [vmem:[#allocation2 + $0x90] sm:$0xff]  ;;  %v61_v51 = vld [vmem:[#allocation2 + $0x98] sm:$0xff] }
  0x1e   :  { %463 = vmatprep.subr.bf16.mxu0 %v568_v0  ;;  %493 = vmatprep.subr.bf16.mxu1 %v568_v0  ;;  %v506_v49 = vpack.c.bf16 %v164_v47, %v163_v46  ;;  %v482_v52 = vpack.c.bf16 %v61_v51, %v60_v50  ;;  %v62_v53 = vld [vmem:[#allocation2 + $0xa0] sm:$0xff]  ;;  %v63_v54 = vld [vmem:[#allocation2 + $0xa8] sm:$0xff]  ;;  %v64_v57 = vld [vmem:[#allocation2 + $0xb0] sm:$0x3f] }
  0x1f   :  { %v485_v55 = vpack.c.bf16 %v63_v54, %v62_v53  ;;  %v40_v58 = vld [vmem:[%s764_s0] sm:$0xff]  ;;  %v165_v59 = vld [vmem:[%s767_s3 + $0x70] sm:$0xff]  ;;  %v166_v60 = vld [vmem:[%s767_s3 + $0x78] sm:$0xff] }
  0x20   :  { %v509_v61 = vpack.c.bf16 %v166_v60, %v165_v59  ;;  %v345_v62 = vld [vmem:[%s766_s2] ss:$0 sm:$0xff]  ;;  %v246_v1 = vld [vmem:[%s769_s5 + $0x8] sm:$0xff]  ;;  %v247_v7 = vld [vmem:[%s769_s5 + $0x10] sm:$0xff] }
  0x21   :  { %465 = vmatpush1.bf16.msra.mxu0 %v464_v18  ;;  %495 = vmatpush3.bf16.msra.mxu1 %v494_v26  ;;  %v245_v63 = vld [vmem:[%s769_s5] sm:$0xff]  ;;  %v248_v8 = vld [vmem:[%s769_s5 + $0x18] sm:$0xff]  ;;  %v250_v11 = vld [vmem:[%s769_s5 + $0x28] sm:$0xff] }
  0x22   :  { %466 = vmatprep.subr.bf16.mxu0 %v568_v0  ;;  %496 = vmatprep.subr.bf16.mxu1 %v568_v0  ;;  %v512_v5 = vpack.c.bf16 %v246_v1, %v245_v63  ;;  %v515_v9 = vpack.c.bf16 %v248_v8, %v247_v7  ;;  %v249_v10 = vld [vmem:[%s769_s5 + $0x20] sm:$0xff]  ;;  %v251_v13 = vld [vmem:[%s769_s5 + $0x30] sm:$0xff]  ;;  %v252_v14 = vld [vmem:[%s769_s5 + $0x38] sm:$0xff] }
  0x23   :  { %v518_v12 = vpack.c.bf16 %v250_v11, %v249_v10  ;;  %v521_v15 = vpack.c.bf16 %v252_v14, %v251_v13  ;;  %v253_v16 = vld [vmem:[%s769_s5 + $0x40] sm:$0xff]  ;;  %v254_v17 = vld [vmem:[%s769_s5 + $0x48] sm:$0xff]  ;;  %v255_v19 = vld [vmem:[%s769_s5 + $0x50] sm:$0xff] }
  0x24   :  { %v524_v18 = vpack.c.bf16 %v254_v17, %v253_v16  ;;  %v256_v20 = vld [vmem:[%s769_s5 + $0x58] sm:$0xff]  ;;  %v257_v22 = vld [vmem:[%s769_s5 + $0x60] sm:$0xff]  ;;  %v258_v23 = vld [vmem:[%s769_s5 + $0x68] sm:$0xff] }
  0x25   :  { %468 = vmatpush1.bf16.msra.mxu0 %v467_v24  ;;  %498 = vmatpush3.bf16.msra.mxu1 %v497_v32  ;;  %v527_v21 = vpack.c.bf16 %v256_v20, %v255_v19  ;;  %v530_v24 = vpack.c.bf16 %v258_v23, %v257_v22  ;;  %v259_v25 = vld [vmem:[%s769_s5 + $0x70] sm:$0xff]  ;;  %v260_v26 = vld [vmem:[%s769_s5 + $0x78] sm:$0xff]  ;;  %v348_v28 = vld [vmem:[%s768_s4] ss:$0 sm:$0xff] }
  0x26   :  { %469 = vmatprep.subr.bf16.mxu0 %v568_v0  ;;  %499 = vmatprep.subr.bf16.mxu1 %v568_v0  ;;  %v533_v27 = vpack.c.bf16 %v260_v26, %v259_v25 }
  0x29   :  { %471 = vmatpush1.bf16.msra.mxu0 %v470_v30  ;;  %501 = vmatpush3.bf16.msra.mxu1 %v500_v38 }
  0x2a   :  { %472 = vmatprep.subr.bf16.mxu0 %v568_v0  ;;  %502 = vmatprep.subr.bf16.mxu1 %v568_v0 }
  0x2d   :  { %474 = vmatpush1.bf16.msra.mxu0 %v473_v36  ;;  %504 = vmatpush3.bf16.msra.mxu1 %v503_v44 }
  0x2e   :  { %475 = vmatprep.subr.bf16.mxu0 %v568_v0  ;;  %505 = vmatprep.subr.bf16.mxu1 %v568_v0 }
  0x31   :  { %477 = vmatpush1.bf16.msra.mxu0 %v476_v42  ;;  %507 = vmatpush3.bf16.msra.mxu1 %v506_v49 }
  0x32   :  { %478 = vmatprep.subr.bf16.mxu0 %v568_v0  ;;  %508 = vmatprep.subr.bf16.mxu1 %v568_v0 }
  0x35   :  { %480 = vmatpush1.bf16.msra.mxu0 %v479_v48  ;;  %510 = vmatpush3.bf16.msra.mxu1 %v509_v61 }
  0x36   :  { %481 = vmatprep.subr.bf16.mxu0 %v568_v0  ;;  %511 = vmatprep.subr.bf16.mxu1 %v568_v0 }
  0x39   :  { %483 = vmatpush1.bf16.msra.mxu0 %v482_v52 }
  0x3a   :  { %484 = vmatprep.subr.bf16.mxu0 %v568_v0 }
  0x3d   :  { %486 = vmatpush1.bf16.msra.mxu0 %v485_v55 }
  0x3e   :  { %124 = vmatprep.subr.mxu0 %v569_v56 }
  0x41   :  { %346 = vmatpush1.msk.msra.mxu0 %vm76_vm1, %v64_v57 }
  0x42   :  { %145 = vmatmul.mubr.f32.vlgmr.msra.gmra.mrb[0].mxu0 %v40_v58 }
 0x115   :  { %v146_v2 = vpop.f32.mrb[0].mxu0 }
 0x116   :  { %v147_v3 = vadd.f32 %v345_v62, %v146_v2  ;;  %v148_v4 = vpop.f32.mrb[1].mxu0 }
 0x118   :  { %v150_v6 = vmax.f32 %v147_v3, 0.0 }
 0x11a   :  { %417 = vmatmul.mubr.f32.vlgmr.msra.gmra.mrb[0].mxu1 %v150_v6 }
 0x11b   :  { %513 = vmatpush3.bf16.msra.mxu1 %v512_v5  ;;  %451 = vmatprep.mubr.msk.f32.mxu1 %vm570_vm2, %v569_v56 }
 0x11c   :  { %514 = vmatprep.subr.bf16.mxu1 %v568_v0 }
 0x11f   :  { %516 = vmatpush3.bf16.msra.mxu1 %v515_v9 }
 0x120   :  { %517 = vmatprep.subr.bf16.mxu1 %v568_v0 }
 0x123   :  { %519 = vmatpush3.bf16.msra.mxu1 %v518_v12 }
 0x124   :  { %520 = vmatprep.subr.bf16.mxu1 %v568_v0 }
 0x127   :  { %522 = vmatpush3.bf16.msra.mxu1 %v521_v15 }
 0x128   :  { %523 = vmatprep.subr.bf16.mxu1 %v568_v0 }
 0x12b   :  { %525 = vmatpush3.bf16.msra.mxu1 %v524_v18 }
 0x12c   :  { %526 = vmatprep.subr.bf16.mxu1 %v568_v0 }
 0x12f   :  { %528 = vmatpush3.bf16.msra.mxu1 %v527_v21 }
 0x130   :  { %529 = vmatprep.subr.bf16.mxu1 %v568_v0 }
 0x133   :  { %531 = vmatpush3.bf16.msra.mxu1 %v530_v24 }
 0x134   :  { %532 = vmatprep.subr.bf16.mxu1 %v568_v0  ;;  %v349_v0 = vld [vmem:[%s770_s6] ss:$0 sm:$0xff] }
 0x137   :  { %534 = vmatpush3.bf16.msra.mxu1 %v533_v27 }
 0x1ed   :  { %v240_v29 = vpop.f32.mrb[0].mxu1 }
 0x1ee   :  { %v241_v30 = vadd.f32 %v348_v28, %v240_v29  ;;  %v418_v31 = vpop.f32.mrb[1].mxu1 }
 0x1f0   :  { %v244_v32 = vmax.f32 %v241_v30, 0.0 }
 0x1f2   :  { %452 = vmatmul.mubr.f32.vlgmr.msra.gmra.mrb[2].mxu1 %v244_v32 }
 0x2c5   :  { %v334_v33 = vpop.f32.mrb[2].mxu1 }
 0x2c6   :  { %v335_v34 = vadd.f32 %v349_v0, %v334_v33  ;;  %v453_v35 = vpop.f32.mrb[3].mxu1 }
 0x2c8   :  { %339 = vst.msk [vmem:[%s771_s7] sm:$0xff] %vm338_vm3, %v335_v34 }
 0x2c9   :  { %344 = vsyncpa [#allocation3], 1 }

</bundles_post_ra>
